<compile_context>
chip_gen: v6e
topology: v6e:2x2x1
jax: 0.10.0
libtpu: 0.0.40
codegen_flags: <defaults>
</compile_context>

<pallas_src>
import functools
import math

import numpy as np
import jax
import jax.numpy as jnp
from jax.experimental import pallas as pl
from jax.experimental.pallas import tpu as pltpu


def _round_up(x, m):
    return ((x + m - 1) // m) * m


# ----------------------------------------------------------------------------
# numpy helpers: fixed (weight-independent) constants + pure-numpy reference
# ----------------------------------------------------------------------------
def _rx_np(theta):
    c = np.cos(theta / 2.0)
    s = np.sin(theta / 2.0)
    return np.array([[c, -1j * s], [-1j * s, c]], dtype=np.complex64)


def _single_qubit_full_np(gate2, wire, n_qubits):
    return np.kron(
        np.eye(2 ** wire, dtype=np.complex64),
        np.kron(gate2, np.eye(2 ** (n_qubits - 1 - wire), dtype=np.complex64)),
    )


def _cnot_full_np(control, target, n_qubits):
    dim = 2 ** n_qubits
    u = np.zeros((dim, dim), dtype=np.complex64)
    cmask = 1 << (n_qubits - 1 - control)
    tmask = 1 << (n_qubits - 1 - target)
    for j in range(dim):
        i = j ^ tmask if (j & cmask) else j
        u[i, j] = 1.0
    return u


def _cnot_ring_np(n_qubits):
    """The per-layer CNOT pattern of BasicEntanglerLayers as one permutation."""
    dim = 2 ** n_qubits
    ring = np.eye(dim, dtype=np.complex64)
    if n_qubits == 2:
        ring = _cnot_full_np(0, 1, n_qubits)
    elif n_qubits > 2:
        for w in range(n_qubits):
            ring = _cnot_full_np(w, (w + 1) % n_qubits, n_qubits) @ ring
    return ring


def _entangler_unitary_np(weights, n_qubits):
    dim = 2 ** n_qubits
    ring = _cnot_ring_np(n_qubits)
    u = np.eye(dim, dtype=np.complex64)
    for l in range(weights.shape[0]):
        for w in range(n_qubits):
            u = _single_qubit_full_np(_rx_np(weights[l, w]), w, n_qubits) @ u
        u = ring @ u
    return u


def _zdiag_np(n_edges, n_qubits):
    """(2^n, n_edges): column w holds the PauliZ diagonal of wire w."""
    dim = 2 ** n_qubits
    z = np.zeros((dim, n_edges), dtype=np.float32)
    for w in range(n_edges):
        mask = 1 << (n_qubits - 1 - w)
        for i in range(dim):
            z[i, w] = -1.0 if (i & mask) else 1.0
    return z


def _z2_np(n_edges, n_qubits, out_pad):
    """(2*2^n, out_pad): Z diagonals duplicated over the [re | im] packed halves,
    zero-padded to a lane-dense output width."""
    dim = 2 ** n_qubits
    zd = _zdiag_np(n_edges, n_qubits)
    z2 = np.zeros((2 * dim, out_pad), dtype=np.float32)
    z2[:dim, :n_edges] = zd
    z2[dim:, :n_edges] = zd
    return z2


# ----------------------------------------------------------------------------
# JAX glue: entangler unitary (jittable, differentiable w.r.t. weights)
# ----------------------------------------------------------------------------
def _entangler_unitary_jax(weights, n_qubits):
    dim = 2 ** n_qubits
    eye2 = jnp.eye(2, dtype=jnp.complex64)
    x_gate = jnp.array([[0.0, 1.0], [1.0, 0.0]], dtype=jnp.complex64)
    ring = jnp.asarray(_cnot_ring_np(n_qubits))
    u = jnp.eye(dim, dtype=jnp.complex64)
    n_layers = weights.shape[0]
    for l in range(n_layers):
        for w in range(n_qubits):
            theta = weights[l, w].astype(jnp.float32)
            rx2 = (jnp.cos(theta * 0.5).astype(jnp.complex64) * eye2
                   - 1j * jnp.sin(theta * 0.5).astype(jnp.complex64) * x_gate)
            full = jnp.kron(
                jnp.eye(2 ** w, dtype=jnp.complex64),
                jnp.kron(rx2, jnp.eye(2 ** (n_qubits - 1 - w),
                                      dtype=jnp.complex64)))
            u = full @ u
        u = ring @ u
    return u


# ----------------------------------------------------------------------------
# Pallas kernel
# ----------------------------------------------------------------------------
def _qgnn_kernel(x_ref, m_ref, z2_ref, out_ref, *, n_intervals, n_qubits):
    tb = x_ref.shape[0]
    dim = 2 ** n_qubits
    dd = 2 * dim                      # packed [re | im] lane width

    # AngleEmbedding parameters computed in-kernel (VPU/EUP slots).
    half_x = x_ref[...] * 0.5
    cosx = jnp.cos(half_x)
    sinx = jnp.sin(half_x)

    # Embedded state is a tensor product of RX(x_q)|0> on embedded wires and |0>
    # elsewhere:  amp(k) = prod_{q<n_int} (cos_q if bit_q(k)=0 else -i*sin_q),
    # and amp(k)=0 if any non-embedded wire bit of k is set.
    # Packed layout: lane j < dim holds Re(amp(j)); lane j+dim holds Im(amp(j)).
    col = jax.lax.broadcasted_iota(jnp.int32, (tb, dd), 1)
    mag = jnp.ones((tb, dd), jnp.float32)
    nflip = jnp.zeros((tb, dd), jnp.int32)
    for q in range(n_intervals):
        mask_q = 1 << (n_qubits - 1 - q)
        on = (col & mask_q) != 0
        mag = mag * jnp.where(on, sinx[:, q:q + 1], cosx[:, q:q + 1])
        nflip = nflip + jnp.where(on, 1, 0)
    tail_mask = 0
    for q in range(n_intervals, n_qubits):
        tail_mask |= 1 << (n_qubits - 1 - q)
    if tail_mask:
        mag = jnp.where((col & tail_mask) == 0, mag, 0.0)
    # phase factor (-i)^nflip:  Re = [1,0,-1,0],  Im = [0,-1,0,1]  (nflip mod 4)
    m4 = nflip & 3
    coef_re = jnp.where(m4 == 0, 1.0, jnp.where(m4 == 2, -1.0, 0.0))
    coef_im = jnp.where(m4 == 1, -1.0, jnp.where(m4 == 3, 1.0, 0.0))
    is_im = col >= dim
    psi = mag * jnp.where(is_im, coef_im, coef_re)          # (tb, 2d) f32

    # BasicEntanglerLayers: single packed (tb,2d)x(2d,2d) MXU matmul,
    # bf16 inputs / f32 accumulation.  [re|im] @ [[Ur^T,Ui^T],[-Ui^T,Ur^T]]
    state = jnp.dot(psi.astype(jnp.bfloat16), m_ref[...],
                    preferred_element_type=jnp.float32)      # (tb, 2d) f32

    # <Z_w> = sum_k z_w[k] * (re_k^2 + im_k^2); Z2 duplicates the diagonal over
    # both packed halves and is zero-padded to 128 lanes -> lane-dense store.
    sq = state * state
    ev = jnp.dot(sq, z2_ref[...], preferred_element_type=jnp.float32)

    # numerically stable softplus
    out_ref[...] = jnp.maximum(ev, 0.0) + jnp.log(1.0 + jnp.exp(-jnp.abs(ev)))


# ----------------------------------------------------------------------------
# Wrapper
# ----------------------------------------------------------------------------
@functools.partial(jax.jit, static_argnums=(2, 3))
def hybrid_quantum_gnn_forward(x, weights, n_intervals, n_edges):
    """x: (batch, n_intervals) f32; weights: (n_layers, n_qubits) f32."""
    n_qubits = max(n_intervals, n_edges)
    dim = 2 ** n_qubits
    dd = 2 * dim
    batch = x.shape[0]

    tb = min(128, _round_up(max(batch, 1), 8))     # batch tile (sublane-aligned)
    b_pad = _round_up(batch, tb)
    out_pad = _round_up(max(n_edges, 1), 128)      # lane-dense output width

    # Entangler unitary as one packed real matrix for row-vectors [re | im].
    u = _entangler_unitary_jax(weights.astype(jnp.float32), n_qubits)
    ure_t = jnp.real(u).T.astype(jnp.float32)
    uim_t = jnp.imag(u).T.astype(jnp.float32)
    m_packed = jnp.concatenate(
        [jnp.concatenate([ure_t, uim_t], axis=1),
         jnp.concatenate([-uim_t, ure_t], axis=1)],
        axis=0).astype(jnp.bfloat16)               # (2d, 2d)

    z2 = jnp.asarray(_z2_np(n_edges, n_qubits, out_pad))     # (2d, out_pad) f32

    x_p = jnp.zeros((b_pad, n_intervals), jnp.float32)
    x_p = x_p.at[:batch].set(x.astype(jnp.float32))

    kernel = functools.partial(_qgnn_kernel, n_intervals=n_intervals,
                               n_qubits=n_qubits)

    out = pl.pallas_call(
        kernel,
        out_shape=jax.ShapeDtypeStruct((b_pad, out_pad), jnp.float32),
        grid_spec=pltpu.PrefetchScalarGridSpec(
            num_scalar_prefetch=0,
            grid=(b_pad // tb,),
            in_specs=[
                pl.BlockSpec((tb, n_intervals), lambda i: (i, 0)),   # x tile
                pl.BlockSpec((dd, dd), lambda i: (0, 0)),            # entangler
                pl.BlockSpec((dd, out_pad), lambda i: (0, 0)),       # Z diag
            ],
            out_specs=pl.BlockSpec((tb, out_pad), lambda i: (i, 0)),
        ),
        compiler_params=pltpu.CompilerParams(
            dimension_semantics=("parallel",)),    # megacore-shardable on v7x
    )(x_p, m_packed, z2)

    return out[:batch, :n_edges]


# ----------------------------------------------------------------------------
# Pure numpy reference (same math) for a sanity check
# ----------------------------------------------------------------------------
def _reference(x_np, weights_np, n_intervals, n_edges):
    n_qubits = max(n_intervals, n_edges)
    dim = 2 ** n_qubits
    u_ent = _entangler_unitary_np(weights_np.astype(np.float64), n_qubits)
    zd = _zdiag_np(n_edges, n_qubits)
    outs = []
    for b in range(x_np.shape[0]):
        psi = np.zeros(dim, dtype=np.complex64)
        psi[0] = 1.0
        for q in range(n_intervals):
            psi = _single_qubit_full_np(_rx_np(x_np[b, q]), q, n_qubits) @ psi
        psi = u_ent @ psi
        probs = np.abs(psi) ** 2
        ev = probs @ zd
        outs.append(np.maximum(ev, 0.0) + np.log1p(np.exp(-np.abs(ev))))
    return np.stack(outs).astype(np.float32)


if __name__ == "__main__":
    n_intervals = 4
    n_edges = 6          # n_qubits = max(4, 6) = 6 -> statevector dim 64
    n_layers = 2
    batch = 2

    key = jax.random.PRNGKey(0)
    key_x, key_w = jax.random.split(key)
    x = jax.random.uniform(key_x, (batch, n_intervals),
                           minval=0.0, maxval=math.pi, dtype=jnp.float32)
    # TorchLayer default init: uniform in [0, 2*pi)
    weights = jax.random.uniform(key_w, (n_layers, max(n_intervals, n_edges)),
                                 minval=0.0, maxval=2.0 * math.pi,
                                 dtype=jnp.float32)

    out = hybrid_quantum_gnn_forward(x, weights, n_intervals, n_edges)
    out = jax.block_until_ready(out)

    ref = _reference(np.asarray(x), np.asarray(weights), n_intervals, n_edges)
    assert out.shape == (batch, n_edges)
    assert np.allclose(np.asarray(out), ref, atol=5e-2), (np.asarray(out), ref)

    print("KERNEL_OK")
</pallas_src>

<mosaic_0001>
module attributes {stable_mosaic.version = 11 : i64} {
  func.func @_qgnn_kernel(%arg0: i32, %arg1: memref<8x4xf32, #tpu.memory_space<vmem>>, %arg2: memref<128x128xbf16, #tpu.memory_space<vmem>>, %arg3: memref<128x128xf32, #tpu.memory_space<vmem>>, %arg4: memref<8x128xf32, #tpu.memory_space<vmem>>) attributes {dimension_semantics = [#tpu.dimension_semantics<parallel>], iteration_bounds = array<i64: 1>, scalar_prefetch = 0 : i64, scratch_operands = 0 : i64, tpu.core_type = #tpu.core_type<tc>, window_params = [{transform_indices = @transform_0, window_bounds = array<i64: 8, 4>}, {pipeline_mode = #tpu.pipeline_mode<synchronous>, transform_indices = @transform_1, window_bounds = array<i64: 128, 128>}, {pipeline_mode = #tpu.pipeline_mode<synchronous>, transform_indices = @transform_2, window_bounds = array<i64: 128, 128>}, {transform_indices = @transform_3, window_bounds = array<i64: 8, 128>}]} {
    %c0 = arith.constant 0 : index
    %c0_0 = arith.constant 0 : index
    %0 = vector.load %arg1[%c0, %c0_0] : memref<8x4xf32, #tpu.memory_space<vmem>>, vector<8x4xf32>
    %cst = arith.constant 5.000000e-01 : f32
    %1 = vector.broadcast %cst : f32 to vector<8x4xf32>
    %2 = arith.mulf %0, %1 : vector<8x4xf32>
    %3 = math.cos %2 : vector<8x4xf32>
    %4 = math.sin %2 : vector<8x4xf32>
    %5 = tpu.iota {dimensions = array<i32: 1>} : vector<8x128xi32>
    %cst_1 = arith.constant 1.000000e+00 : f32
    %6 = vector.broadcast %cst_1 : f32 to vector<8x128xf32>
    %c0_i32 = arith.constant 0 : i32
    %7 = vector.broadcast %c0_i32 : i32 to vector<8x128xi32>
    %c32_i32 = arith.constant 32 : i32
    %8 = vector.broadcast %c32_i32 : i32 to vector<8x128xi32>
    %9 = arith.andi %5, %8 : vector<8x128xi32>
    %c0_i32_2 = arith.constant 0 : i32
    %10 = vector.broadcast %c0_i32_2 : i32 to vector<8x128xi32>
    %11 = arith.cmpi ne, %9, %10 : vector<8x128xi32>
    %12 = vector.extract_strided_slice %4 {offsets = [0, 0], sizes = [8, 1], strides = [1, 1]} : vector<8x4xf32> to vector<8x1xf32>
    %13 = vector.extract_strided_slice %3 {offsets = [0, 0], sizes = [8, 1], strides = [1, 1]} : vector<8x4xf32> to vector<8x1xf32>
    %14 = vector.shape_cast %12 : vector<8x1xf32> to vector<8x1xf32>
    %15 = vector.broadcast %14 : vector<8x1xf32> to vector<8x128xf32>
    %16 = vector.shape_cast %13 : vector<8x1xf32> to vector<8x1xf32>
    %17 = vector.broadcast %16 : vector<8x1xf32> to vector<8x128xf32>
    %18 = arith.select %11, %15, %17 : vector<8x128xi1>, vector<8x128xf32>
    %19 = arith.mulf %6, %18 : vector<8x128xf32>
    %c1_i32 = arith.constant 1 : i32
    %c0_i32_3 = arith.constant 0 : i32
    %20 = vector.broadcast %c1_i32 : i32 to vector<8x128xi32>
    %21 = vector.broadcast %c0_i32_3 : i32 to vector<8x128xi32>
    %22 = arith.select %11, %20, %21 : vector<8x128xi1>, vector<8x128xi32>
    %23 = arith.addi %7, %22 : vector<8x128xi32>
    %c16_i32 = arith.constant 16 : i32
    %24 = vector.broadcast %c16_i32 : i32 to vector<8x128xi32>
    %25 = arith.andi %5, %24 : vector<8x128xi32>
    %c0_i32_4 = arith.constant 0 : i32
    %26 = vector.broadcast %c0_i32_4 : i32 to vector<8x128xi32>
    %27 = arith.cmpi ne, %25, %26 : vector<8x128xi32>
    %28 = vector.extract_strided_slice %4 {offsets = [0, 1], sizes = [8, 1], strides = [1, 1]} : vector<8x4xf32> to vector<8x1xf32>
    %29 = vector.extract_strided_slice %3 {offsets = [0, 1], sizes = [8, 1], strides = [1, 1]} : vector<8x4xf32> to vector<8x1xf32>
    %30 = vector.shape_cast %28 : vector<8x1xf32> to vector<8x1xf32>
    %31 = vector.broadcast %30 : vector<8x1xf32> to vector<8x128xf32>
    %32 = vector.shape_cast %29 : vector<8x1xf32> to vector<8x1xf32>
    %33 = vector.broadcast %32 : vector<8x1xf32> to vector<8x128xf32>
    %34 = arith.select %27, %31, %33 : vector<8x128xi1>, vector<8x128xf32>
    %35 = arith.mulf %19, %34 : vector<8x128xf32>
    %c1_i32_5 = arith.constant 1 : i32
    %c0_i32_6 = arith.constant 0 : i32
    %36 = vector.broadcast %c1_i32_5 : i32 to vector<8x128xi32>
    %37 = vector.broadcast %c0_i32_6 : i32 to vector<8x128xi32>
    %38 = arith.select %27, %36, %37 : vector<8x128xi1>, vector<8x128xi32>
    %39 = arith.addi %23, %38 : vector<8x128xi32>
    %c8_i32 = arith.constant 8 : i32
    %40 = vector.broadcast %c8_i32 : i32 to vector<8x128xi32>
    %41 = arith.andi %5, %40 : vector<8x128xi32>
    %c0_i32_7 = arith.constant 0 : i32
    %42 = vector.broadcast %c0_i32_7 : i32 to vector<8x128xi32>
    %43 = arith.cmpi ne, %41, %42 : vector<8x128xi32>
    %44 = vector.extract_strided_slice %4 {offsets = [0, 2], sizes = [8, 1], strides = [1, 1]} : vector<8x4xf32> to vector<8x1xf32>
    %45 = vector.extract_strided_slice %3 {offsets = [0, 2], sizes = [8, 1], strides = [1, 1]} : vector<8x4xf32> to vector<8x1xf32>
    %46 = vector.shape_cast %44 : vector<8x1xf32> to vector<8x1xf32>
    %47 = vector.broadcast %46 : vector<8x1xf32> to vector<8x128xf32>
    %48 = vector.shape_cast %45 : vector<8x1xf32> to vector<8x1xf32>
    %49 = vector.broadcast %48 : vector<8x1xf32> to vector<8x128xf32>
    %50 = arith.select %43, %47, %49 : vector<8x128xi1>, vector<8x128xf32>
    %51 = arith.mulf %35, %50 : vector<8x128xf32>
    %c1_i32_8 = arith.constant 1 : i32
    %c0_i32_9 = arith.constant 0 : i32
    %52 = vector.broadcast %c1_i32_8 : i32 to vector<8x128xi32>
    %53 = vector.broadcast %c0_i32_9 : i32 to vector<8x128xi32>
    %54 = arith.select %43, %52, %53 : vector<8x128xi1>, vector<8x128xi32>
    %55 = arith.addi %39, %54 : vector<8x128xi32>
    %c4_i32 = arith.constant 4 : i32
    %56 = vector.broadcast %c4_i32 : i32 to vector<8x128xi32>
    %57 = arith.andi %5, %56 : vector<8x128xi32>
    %c0_i32_10 = arith.constant 0 : i32
    %58 = vector.broadcast %c0_i32_10 : i32 to vector<8x128xi32>
    %59 = arith.cmpi ne, %57, %58 : vector<8x128xi32>
    %60 = vector.extract_strided_slice %4 {offsets = [0, 3], sizes = [8, 1], strides = [1, 1]} : vector<8x4xf32> to vector<8x1xf32>
    %61 = vector.extract_strided_slice %3 {offsets = [0, 3], sizes = [8, 1], strides = [1, 1]} : vector<8x4xf32> to vector<8x1xf32>
    %62 = vector.shape_cast %60 : vector<8x1xf32> to vector<8x1xf32>
    %63 = vector.broadcast %62 : vector<8x1xf32> to vector<8x128xf32>
    %64 = vector.shape_cast %61 : vector<8x1xf32> to vector<8x1xf32>
    %65 = vector.broadcast %64 : vector<8x1xf32> to vector<8x128xf32>
    %66 = arith.select %59, %63, %65 : vector<8x128xi1>, vector<8x128xf32>
    %67 = arith.mulf %51, %66 : vector<8x128xf32>
    %c1_i32_11 = arith.constant 1 : i32
    %c0_i32_12 = arith.constant 0 : i32
    %68 = vector.broadcast %c1_i32_11 : i32 to vector<8x128xi32>
    %69 = vector.broadcast %c0_i32_12 : i32 to vector<8x128xi32>
    %70 = arith.select %59, %68, %69 : vector<8x128xi1>, vector<8x128xi32>
    %71 = arith.addi %55, %70 : vector<8x128xi32>
    %c3_i32 = arith.constant 3 : i32
    %72 = vector.broadcast %c3_i32 : i32 to vector<8x128xi32>
    %73 = arith.andi %5, %72 : vector<8x128xi32>
    %c0_i32_13 = arith.constant 0 : i32
    %74 = vector.broadcast %c0_i32_13 : i32 to vector<8x128xi32>
    %75 = arith.cmpi eq, %73, %74 : vector<8x128xi32>
    %cst_14 = arith.constant 0.000000e+00 : f32
    %76 = vector.broadcast %cst_14 : f32 to vector<8x128xf32>
    %77 = arith.select %75, %67, %76 : vector<8x128xi1>, vector<8x128xf32>
    %c3_i32_15 = arith.constant 3 : i32
    %78 = vector.broadcast %c3_i32_15 : i32 to vector<8x128xi32>
    %79 = arith.andi %71, %78 : vector<8x128xi32>
    %c0_i32_16 = arith.constant 0 : i32
    %80 = vector.broadcast %c0_i32_16 : i32 to vector<8x128xi32>
    %81 = arith.cmpi eq, %79, %80 : vector<8x128xi32>
    %c2_i32 = arith.constant 2 : i32
    %82 = vector.broadcast %c2_i32 : i32 to vector<8x128xi32>
    %83 = arith.cmpi eq, %79, %82 : vector<8x128xi32>
    %cst_17 = arith.constant -1.000000e+00 : f32
    %cst_18 = arith.constant 0.000000e+00 : f32
    %84 = vector.broadcast %cst_17 : f32 to vector<8x128xf32>
    %85 = vector.broadcast %cst_18 : f32 to vector<8x128xf32>
    %86 = arith.select %83, %84, %85 : vector<8x128xi1>, vector<8x128xf32>
    %cst_19 = arith.constant 1.000000e+00 : f32
    %87 = vector.broadcast %cst_19 : f32 to vector<8x128xf32>
    %88 = arith.select %81, %87, %86 : vector<8x128xi1>, vector<8x128xf32>
    %c1_i32_20 = arith.constant 1 : i32
    %89 = vector.broadcast %c1_i32_20 : i32 to vector<8x128xi32>
    %90 = arith.cmpi eq, %79, %89 : vector<8x128xi32>
    %c3_i32_21 = arith.constant 3 : i32
    %91 = vector.broadcast %c3_i32_21 : i32 to vector<8x128xi32>
    %92 = arith.cmpi eq, %79, %91 : vector<8x128xi32>
    %cst_22 = arith.constant 1.000000e+00 : f32
    %cst_23 = arith.constant 0.000000e+00 : f32
    %93 = vector.broadcast %cst_22 : f32 to vector<8x128xf32>
    %94 = vector.broadcast %cst_23 : f32 to vector<8x128xf32>
    %95 = arith.select %92, %93, %94 : vector<8x128xi1>, vector<8x128xf32>
    %cst_24 = arith.constant -1.000000e+00 : f32
    %96 = vector.broadcast %cst_24 : f32 to vector<8x128xf32>
    %97 = arith.select %90, %96, %95 : vector<8x128xi1>, vector<8x128xf32>
    %c64_i32 = arith.constant 64 : i32
    %98 = vector.broadcast %c64_i32 : i32 to vector<8x128xi32>
    %99 = arith.cmpi sge, %5, %98 : vector<8x128xi32>
    %100 = arith.select %99, %97, %88 : vector<8x128xi1>, vector<8x128xf32>
    %101 = arith.mulf %77, %100 : vector<8x128xf32>
    %102 = arith.truncf %101 : vector<8x128xf32> to vector<8x128xbf16>
    %c0_25 = arith.constant 0 : index
    %c0_26 = arith.constant 0 : index
    %103 = vector.load %arg2[%c0_25, %c0_26] : memref<128x128xbf16, #tpu.memory_space<vmem>>, vector<128x128xbf16>
    %cst_27 = arith.constant dense<0.000000e+00> : vector<8x128xf32>
    %104 = tpu.matmul %102, %103, %cst_27 {dimension_numbers = #tpu.dot_dimension_numbers<[1], [0], [0], [1], [0, 0, 1, 1], [], []>} : vector<8x128xbf16>, vector<128x128xbf16>, vector<8x128xf32> -> vector<8x128xf32>
    %105 = arith.mulf %104, %104 : vector<8x128xf32>
    %c0_28 = arith.constant 0 : index
    %c0_29 = arith.constant 0 : index
    %106 = vector.load %arg3[%c0_28, %c0_29] : memref<128x128xf32, #tpu.memory_space<vmem>>, vector<128x128xf32>
    %cst_30 = arith.constant dense<0.000000e+00> : vector<8x128xf32>
    %107 = tpu.matmul %105, %106, %cst_30 {dimension_numbers = #tpu.dot_dimension_numbers<[1], [0], [0], [1], [0, 0, 1, 1], [], []>} : vector<8x128xf32>, vector<128x128xf32>, vector<8x128xf32> -> vector<8x128xf32>
    %cst_31 = arith.constant 0.000000e+00 : f32
    %108 = vector.broadcast %cst_31 : f32 to vector<8x128xf32>
    %109 = arith.maximumf %107, %108 : vector<8x128xf32>
    %110 = math.absf %107 : vector<8x128xf32>
    %cst_32 = arith.constant 0.000000e+00 : f32
    %111 = vector.broadcast %cst_32 : f32 to vector<8x128xf32>
    %112 = arith.subf %111, %110 : vector<8x128xf32>
    %113 = math.exp %112 : vector<8x128xf32>
    %cst_33 = arith.constant 1.000000e+00 : f32
    %114 = vector.broadcast %cst_33 : f32 to vector<8x128xf32>
    %115 = arith.addf %114, %113 : vector<8x128xf32>
    %116 = math.log %115 : vector<8x128xf32>
    %117 = arith.addf %109, %116 : vector<8x128xf32>
    %c0_34 = arith.constant 0 : index
    %c0_35 = arith.constant 0 : index
    %118 = vector.load %arg4[%c0_34, %c0_35] : memref<8x128xf32, #tpu.memory_space<vmem>>, vector<8x128xf32>
    tpu.vector_store %arg4[%c0_34, %c0_35], %117 {strides = array<i32>} : memref<8x128xf32, #tpu.memory_space<vmem>>, vector<8x128xf32>,
    return
  }
  func.func @transform_0(%arg0: i32) -> (i32, i32) {
    %c0_i32 = arith.constant 0 : i32
    %c0_i32_0 = arith.constant 0 : i32
    return %arg0, %c0_i32 : i32, i32
  }
  func.func @transform_1(%arg0: i32) -> (i32, i32) {
    %c0_i32 = arith.constant 0 : i32
    %c0_i32_0 = arith.constant 0 : i32
    %c0_i32_1 = arith.constant 0 : i32
    return %c0_i32, %c0_i32_0 : i32, i32
  }
  func.func @transform_2(%arg0: i32) -> (i32, i32) {
    %c0_i32 = arith.constant 0 : i32
    %c0_i32_0 = arith.constant 0 : i32
    %c0_i32_1 = arith.constant 0 : i32
    return %c0_i32, %c0_i32_0 : i32, i32
  }
  func.func @transform_3(%arg0: i32) -> (i32, i32) {
    %c0_i32 = arith.constant 0 : i32
    %c0_i32_0 = arith.constant 0 : i32
    return %arg0, %c0_i32 : i32, i32
  }
}

</mosaic_0001>

<bundles_post_ra>
// kernel: hybrid_quantum_gnn_forward.1
= control target key start
LH: loop header
LB: loop body
LE: loop exit
PB: predicated region body
PF: predicated region fallthrough
CT: control target
= control target key end

     0   :  { %v638_v0 = vmov 1   ;;  %v639_v1 = vmov 0   ;;  %v640_v6 = vmov 0.0   ;;  %v641_v19 = vmov 683565275   ;;  %s834_s0 = inlined_call_operand.vmem [shape: f32[8,4], index: 0, kind: input, shape index: {}]   ;;  %s835_s1 = inlined_call_operand.vmem [shape: bf16[128,128], index: 1, kind: input, shape index: {}]   ;;  %s836_s2 = inlined_call_operand.vmem [shape: f32[128,128], index: 2, kind: input, shape index: {}]   ;;  %s837_s3 = inlined_call_operand.vmem [shape: f32[8,128], index: 3, kind: output, shape index: {}]  }
   0x1   :  { %617 = vset.pattern.permute.xlu1 %v638_v0  ;;  %616 = vset.pattern.permute.xlu0 %v639_v1  ;;  %v15_v2 = vld [vmem:[%s834_s0] sm:$0xff]  ;;  %v622_v4 = vld [vmem:[%s835_s1 + $0x38] sm:$0xff]   ;;  %v623_v7 = vld [vmem:[%s835_s1 + $0x30] sm:$0xff]   ;;  %v642_v21 = vmov 2475754826  }
   0x2   :  { %v674_v3 = vmul.f32 0.5, %v15_v2  ;;  %545 = vmatprep.subr.bf16.mxu0 %v640_v6  ;;  %565 = vmatprep.subr.mxu1 %v640_v6  ;;  %v624_v11 = vld [vmem:[%s835_s1 + $0x28] sm:$0xff]   ;;  %v643_v23 = vmov 2131351028   ;;  %v644_v25 = vmov 2102212464  }
   0x3   :  { %546 = vmatpush3.bf16.msra.mxu0 %v622_v4  ;;  %v645_v27 = vmov 920167782   ;;  %v646_v34 = vmov 1326507024  }
   0x4   :  { %v20_v5 = vand.u32 2139095040, %v674_v3  ;;  %v17_v8 = vand.u32 2147483647, %v674_v3  ;;  %547 = vmatprep.subr.bf16.mxu0 %v640_v6  ;;  %vm19_vm7 = vcmp.lt.s32.totalorder %v674_v3, 0  ;;  %vm109_vm15 = vweird.f32 %v674_v3 }
   0x6   :  { %v21_v9 = vshrl.u32 %v20_v5, 23  ;;  %v24_v13 = vand.u32 8388607, %v17_v8  ;;  %vm18_vm8 = vcmp.le.f32.partialorder %v17_v8, 0.7853982  ;;  %v625_v8 = vld [vmem:[%s835_s1 + $0x20] sm:$0xff]  }
   0x7   :  { %548 = vmatpush3.bf16.msra.mxu0 %v623_v7 }
   0x8   :  { %v503_v10 = vadd.s32 4294967169, %v21_v9  ;;  %549 = vmatprep.subr.bf16.mxu0 %v640_v6  ;;  %v25_v16 = vor.u32 8388608, %v24_v13 }
   0xa   :  { %v27_v12 = vadd.s32 1, %v503_v10  ;;  %v65_v36 = vshll.u32 %v25_v16, 8 }
   0xb   :  { %550 = vmatpush3.bf16.msra.mxu0 %v624_v11 }
   0xc   :  { %vm28_vm0 = vcmp.gt.s32.totalorder %v27_v12, 0  ;;  %551 = vmatprep.subr.bf16.mxu0 %v640_v6 }
   0xd   :  { %v29_v14 = vsel %vm28_vm0, %v27_v12, 0  ;;  %vm649_vm0 = vmmov 0  }
   0xe   :  { %v31_v15 = vand.u32 31, %v29_v14  ;;  %v30_v17 = vshrl.u32 %v29_v14, 5  ;;  %561 = vmatprep.mubr.msk.bf16.mxu0 %vm649_vm0, %v640_v6  ;;  %597 = vmatprep.mubr.msk.f32.mxu1 %vm649_vm0, %v640_v6 }
   0xf   :  { %552 = vmatpush3.bf16.msra.mxu0 %v625_v8 }
  0x10   :  { %v32_v18 = vsub.s32 32, %v31_v15  ;;  %v34_v20 = vshll.u32 %v641_v19, %v31_v15  ;;  %v37_v22 = vshll.u32 %v642_v21, %v31_v15  ;;  %v40_v24 = vshll.u32 %v643_v23, %v31_v15  ;;  %553 = vmatprep.subr.bf16.mxu0 %v640_v6 }
  0x11   :  { %v43_v26 = vshll.u32 %v644_v25, %v31_v15  ;;  %v46_v28 = vshll.u32 %v645_v27, %v31_v15  ;;  %vm49_vm1 = vcmp.lt.s32.totalorder %v30_v17, 1  ;;  %vm52_vm2 = vcmp.lt.s32.totalorder %v30_v17, 4 }
  0x12   :  { %v33_v29 = vshrl.u32 %v641_v19, %v32_v18  ;;  %v35_v30 = vshrl.u32 %v642_v21, %v32_v18  ;;  %v38_v31 = vshrl.u32 %v643_v23, %v32_v18  ;;  %v41_v32 = vshrl.u32 %v644_v25, %v32_v18 }
  0x13   :  { %v44_v33 = vshrl.u32 %v645_v27, %v32_v18  ;;  %v47_v35 = vshrl.u32 %v646_v34, %v32_v18  ;;  %vm50_vm3 = vcmp.lt.s32.totalorder %v30_v17, 2  ;;  %vm51_vm4 = vcmp.lt.s32.totalorder %v30_v17, 3 }
  0x14   :  { %v36_v37 = vor.u32 %v35_v30, %v34_v20  ;;  %v39_v38 = vor.u32 %v38_v31, %v37_v22  ;;  %v42_v39 = vor.u32 %v41_v32, %v40_v24 }
  0x15   :  { %v45_v40 = vor.u32 %v44_v33, %v43_v26  ;;  %v48_v41 = vor.u32 %v47_v35, %v46_v28 }
  0x16   :  { %v53_v42 = vsel %vm49_vm1, %v33_v29, %v36_v37  ;;  %v54_v43 = vsel %vm52_vm2, %v42_v39, 2102212464  ;;  %v57_v44 = vsel %vm49_vm1, %v36_v37, %v39_v38  ;;  %v61_v45 = vsel %vm49_vm1, %v39_v38, %v42_v39 }
  0x17   :  { %v55_v46 = vsel %vm51_vm4, %v39_v38, %v54_v43  ;;  %v58_v47 = vsel %vm52_vm2, %v45_v40, 920167782  ;;  %v62_v48 = vsel %vm52_vm2, %v48_v41, 1326507024 }
  0x18   :  { %v59_v49 = vsel %vm51_vm4, %v42_v39, %v58_v47  ;;  %v63_v50 = vsel %vm51_vm4, %v45_v40, %v62_v48  ;;  %v56_v51 = vsel %vm50_vm3, %v53_v42, %v55_v46  ;;  %v628_v46 = vld [vmem:[%s835_s1 + $0x8] sm:$0xff]   ;;  %v648_v47 = vmov 3   ;;  %v629_v48 = vld [vmem:[%s835_s1] sm:$0xff]  }
  0x19   :  { %v60_v52 = vsel %vm50_vm3, %v57_v44, %v59_v49  ;;  %v64_v53 = vsel %vm50_vm3, %v61_v45, %v63_v50  ;;  %v72_v58 = vmul.u32 %v65_v36, %v56_v51  ;;  %v626_v44 = vld [vmem:[%s835_s1 + $0x18] sm:$0xff]   ;;  %v647_v45 = vmov 2   ;;  %v417_v50 = vld [vmem:[%s836_s2 + $0x70] sm:$0xff]  ;;  %v416_v51 = vld [vmem:[%s836_s2 + $0x68] sm:$0xff] }
  0x1a   :  { %v694_v54 = vmul.u32.u64.low %v65_v36, %v64_v53  ;;  %v695_v55 = vmul.u32.u64.high %v65_v36, %v64_v53, %v694_v54  ;;  %v697_v56 = vmul.u32.u64.low %v65_v36, %v60_v52  ;;  %v698_v57 = vmul.u32.u64.high %v65_v36, %v60_v52, %v697_v56  ;;  %554 = vmatpush3.bf16.msra.mxu0 %v626_v44  ;;  %v418_v49 = vld [vmem:[%s836_s2 + $0x78] sm:$0xff]  ;;  %v415_v52 = vld [vmem:[%s836_s2 + $0x60] sm:$0xff] }
  0x1b   :  { %555 = vmatprep.subr.bf16.mxu0 %v640_v6  ;;  %566 = vmatpush3.msra.mxu1 %v418_v49  ;;  %v414_v53 = vld [vmem:[%s836_s2 + $0x58] sm:$0xff]  ;;  %v413_v54 = vld [vmem:[%s836_s2 + $0x50] sm:$0xff]  ;;  %v403_v44 = vld [vmem:[%s836_s2] sm:$0xff] }
  0x1c   :  { %vm74_vm5 = vc.u32 %v695_v55, %v697_v56  ;;  %v75_v59 = vadd.s32 1, %v698_v57  ;;  %v73_v10 = vadd.s32 %v697_v56, %v695_v55  ;;  %567 = vmatprep.subr.mxu1 %v640_v6  ;;  %v412_v55 = vld [vmem:[%s836_s2 + $0x48] sm:$0xff]  ;;  %v411_v56 = vld [vmem:[%s836_s2 + $0x40] sm:$0xff] }
  0x1d   :  { %568 = vmatpush3.msra.mxu1 %v417_v50 }
  0x1e   :  { %v76_v60 = vsel %vm74_vm5, %v75_v59, %v698_v57  ;;  %569 = vmatprep.subr.mxu1 %v640_v6  ;;  %v410_v57 = vld [vmem:[%s836_s2 + $0x38] sm:$0xff]  ;;  %v408_v59 = vld [vmem:[%s836_s2 + $0x28] sm:$0xff] }
  0x1f   :  { %v77_v61 = vadd.s32 %v76_v60, %v72_v58  ;;  %570 = vmatpush3.msra.mxu1 %v416_v51  ;;  %v409_v58 = vld [vmem:[%s836_s2 + $0x30] sm:$0xff]  ;;  %v407_v60 = vld [vmem:[%s836_s2 + $0x20] sm:$0xff] }
  0x20   :  { %571 = vmatprep.subr.mxu1 %v640_v6 }
  0x21   :  { %v78_v62 = vadd.s32 536870912, %v77_v61  ;;  %572 = vmatpush3.msra.mxu1 %v415_v52 }
  0x22   :  { %573 = vmatprep.subr.mxu1 %v640_v6 }
  0x23   :  { %v79_v63 = vshrl.u32 %v78_v62, 30  ;;  %574 = vmatpush3.msra.mxu1 %v414_v53  ;;  %v405_v62 = vld [vmem:[%s836_s2 + $0x10] sm:$0xff] }
  0x24   :  { %575 = vmatprep.subr.mxu1 %v640_v6 }
  0x25   :  { %v80_v0 = vshll.u32 %v79_v63, 30  ;;  %v103_v23 = vsub.s32 4, %v79_v63  ;;  %576 = vmatpush3.msra.mxu1 %v413_v54 }
  0x26   :  { %577 = vmatprep.subr.mxu1 %v640_v6 }
  0x27   :  { %v81_v2 = vsub.s32 %v77_v61, %v80_v0  ;;  %v104_v26 = vsel %vm19_vm7, %v103_v23, %v79_v63  ;;  %578 = vmatpush3.msra.mxu1 %v412_v55  ;;  %v406_v61 = vld [vmem:[%s836_s2 + $0x18] sm:$0xff]  ;;  %v224_v63 = vlaneseq }
  0x28   :  { %v106_v28 = vsel %vm18_vm8, 0, %v104_v26  ;;  %579 = vmatprep.subr.mxu1 %v640_v6 }
  0x29   :  { %v83_v4 = vsub.s32 0, %v81_v2  ;;  %v213_v29 = vadd.s32 3, %v106_v28  ;;  %v110_v31 = vand.u32 3, %v106_v28  ;;  %580 = vmatpush3.msra.mxu1 %v411_v56  ;;  %v225_v0 = vand.u32 127, %v224_v63 }
  0x2a   :  { %581 = vmatprep.subr.mxu1 %v640_v6 }
  0x2b   :  { %v504_v5 = vmin.u32 %v83_v4, %v81_v2  ;;  %v214_v30 = vand.u32 3, %v213_v29  ;;  %vm115_vm10 = vcmp.eq.s32.totalorder %v110_v31, 2  ;;  %vm112_vm12 = vcmp.eq.s32.totalorder %v110_v31, 0  ;;  %582 = vmatpush3.msra.mxu1 %v410_v57 }
  0x2c   :  { %vm111_vm14 = vcmp.lt.s32.totalorder %v110_v31, 2  ;;  %583 = vmatprep.subr.mxu1 %v640_v6  ;;  %v226_v4 = vand.u32 32, %v225_v0  ;;  %v282_v31 = vand.u32 3, %v225_v0 }
  0x2d   :  { %v85_v7 = vclz %v504_v5  ;;  %vm219_vm9 = vcmp.eq.s32.totalorder %v214_v30, 2  ;;  %vm216_vm11 = vcmp.eq.s32.totalorder %v214_v30, 0  ;;  %vm215_vm13 = vcmp.lt.s32.totalorder %v214_v30, 2  ;;  %584 = vmatpush3.msra.mxu1 %v409_v58 }
  0x2e   :  { %585 = vmatprep.subr.mxu1 %v640_v6  ;;  %vm790_vm2 = vcmp.ne.s32.totalorder %v226_v4, 0 }
  0x2f   :  { %v505_v9 = vadd.s32 4294967294, %v85_v7  ;;  %586 = vmatpush3.msra.mxu1 %v408_v59 }
  0x30   :  { %587 = vmatprep.subr.mxu1 %v640_v6 }
  0x31   :  { %vm506_vm6 = vcmp.lt.s32.totalorder %v505_v9, 0  ;;  %588 = vmatpush3.msra.mxu1 %v407_v60 }
  0x32   :  { %v88_v11 = vsel %vm506_vm6, 0, %v505_v9  ;;  %589 = vmatprep.subr.mxu1 %v640_v6  ;;  %v254_v9 = vand.u32 8, %v225_v0 }
  0x33   :  { %v89_v12 = vsub.s32 32, %v88_v11  ;;  %v90_v13 = vshll.u32 %v81_v2, %v88_v11  ;;  %v93_v14 = vsub.s32 4294967266, %v88_v11  ;;  %590 = vmatpush3.msra.mxu1 %v406_v61  ;;  %v240_v2 = vand.u32 16, %v225_v0 }
  0x34   :  { %591 = vmatprep.subr.mxu1 %v640_v6  ;;  %v239_v11 = vsel %vm790_vm2, 1, %v639_v1  ;;  %vm800_vm3 = vcmp.ne.s32.totalorder %v254_v9, 0 }
  0x35   :  { %v91_v15 = vshrl.u32 %v73_v10, %v89_v12  ;;  %v94_v16 = vadd.s32 127, %v93_v14  ;;  %592 = vmatpush3.msra.mxu1 %v405_v62  ;;  %vm786_vm1 = vcmp.ne.s32.totalorder %v240_v2, 0 }
  0x36   :  { %593 = vmatprep.subr.mxu1 %v640_v6  ;;  %v252_v10 = vsel %vm786_vm1, 1, %v639_v1 }
  0x37   :  { %v92_v17 = vor.u32 %v91_v15, %v90_v13  ;;  %v95_v18 = vshll.u32 %v94_v16, 23  ;;  %v268_v13 = vand.u32 4, %v225_v0  ;;  %v253_v14 = vadd.s32 %v252_v10, %v239_v11 }
  0x38   :  { %v266_v15 = vsel %vm800_vm3, 1, %v639_v1 }
  0x39   :  { %v96_v19 = vor.u32 4788187, %v95_v18  ;;  %v99_v20 = vcvt.s32.f32 %v92_v17  ;;  %vm807_vm4 = vcmp.ne.s32.totalorder %v268_v13, 0  ;;  %v267_v17 = vadd.s32 %v266_v15, %v253_v14 }
  0x3a   :  { %v280_v18 = vsel %vm807_vm4, 1, %v639_v1 }
  0x3b   :  { %v97_v21 = vand.u32 2147483647, %v96_v19  ;;  %v281_v19 = vadd.s32 %v280_v18, %v267_v17 }
  0x3d   :  { %v100_v22 = vmul.f32 %v99_v20, %v97_v21 }
  0x3f   :  { %v101_v24 = vxor.u32 2147483648, %v100_v22 }
  0x41   :  { %v102_v25 = vsel %vm19_vm7, %v101_v24, %v100_v22  ;;  %v285_v22 = vand.u32 3, %v281_v19 }
  0x42   :  { %v105_v27 = vsel %vm18_vm8, %v674_v3, %v102_v25  ;;  %v627_v3 = vld [vmem:[%s835_s1 + $0x10] sm:$0xff]  }
  0x43   :  { %630 = vcosq.f32 %v105_v27  ;;  %556 = vmatpush3.bf16.msra.mxu0 %v627_v3  ;;  %vm287_vm5 = vcmp.eq.s32.totalorder %v285_v22, 2  ;;  %vm291_vm6 = vcmp.eq.s32.totalorder %v285_v22, 3  ;;  %vm286_vm7 = vcmp.eq.s32.totalorder %v285_v22, 0 }
  0x44   :  { %632 = vsinq.f32 %v105_v27  ;;  %557 = vmatprep.subr.bf16.mxu0 %v640_v6  ;;  %v288_v29 = vsel %vm287_vm5, -1.0, %v640_v6  ;;  %vm290_vm8 = vcmp.eq.s32.totalorder %v285_v22, 1  ;;  %v292_v1 = vsel %vm291_vm6, 1.0, %v640_v6 }
  0x47   :  { %558 = vmatpush3.bf16.msra.mxu0 %v628_v46 }
  0x48   :  { %559 = vmatprep.subr.bf16.mxu0 %v640_v6 }
  0x4b   :  { %560 = vmatpush3.bf16.msra.mxu0 %v629_v48 }
  0x50   :  { %v631_v32 = vpop.eup %630 }
  0x51   :  { %v633_v33 = vpop.eup %632  ;;  %v116_v34 = vxor.u32 2147483648, %v631_v32 }
  0x52   :  { %v113_v35 = vxor.u32 2147483648, %v633_v33 }
  0x53   :  { %v221_v36 = vsel %vm219_vm9, %v116_v34, %v633_v33  ;;  %v117_v37 = vsel %vm115_vm10, %v116_v34, %v633_v33  ;;  %v289_v33 = vsel %vm286_vm7, 1.0, %v288_v29  ;;  %v293_v34 = vsel %vm290_vm8, -1.0, %v292_v1 }
  0x54   :  { %v218_v38 = vsel %vm216_vm11, %v631_v32, %v113_v35  ;;  %v114_v39 = vsel %vm112_vm12, %v631_v32, %v113_v35  ;;  %vm294_vm9 = vcmp.ge.s32.totalorder %v225_v0, 64  ;;  %vm283_vm10 = vcmp.eq.s32.totalorder %v282_v31, 0 }
  0x55   :  { %v222_v40 = vsel %vm215_vm13, %v218_v38, %v221_v36  ;;  %v118_v41 = vsel %vm111_vm14, %v114_v39, %v117_v37  ;;  %v295_v39 = vsel %vm294_vm9, %v293_v34, %v289_v33 }
  0x56   :  { %v223_v42 = vsel %vm109_vm15, nan, %v222_v40  ;;  %v119_v43 = vsel %vm109_vm15, nan, %v118_v41 }
  0x57   :  { %243 = vperm.xlu1 %617, %v223_v42   ;;  %230 = vperm.xlu0 %616, %v223_v42  }
  0x5b   :  { %247 = vperm.xlu1 %617, %v119_v43   ;;  %235 = vperm.xlu0 %616, %v119_v43  }
  0x5f   :  { %619 = vset.pattern.permute.xlu1 %v647_v45  ;;  %618 = vset.pattern.permute.xlu0 %v647_v45 }
  0x60   :  { %261 = vperm.xlu1 %619, %v119_v43   ;;  %257 = vperm.xlu0 %618, %v223_v42  }
  0x64   :  { %620 = vset.pattern.permute.xlu1 %v648_v47  ;;  %621 = vset.pattern.permute.xlu0 %v648_v47 }
  0x65   :  { %271 = vperm.xlu1 %620, %v223_v42   ;;  %275 = vperm.xlu0 %621, %v119_v43   ;;  %v404_v43 = vld [vmem:[%s836_s2 + $0x8] sm:$0xff] }
  0x66   :  { %594 = vmatpush3.msra.mxu1 %v404_v43 }
  0x67   :  { %595 = vmatprep.subr.mxu1 %v640_v6 }
  0x68   :  { %596 = vmatpush3.msra.mxu1 %v403_v44 }
  0xd2   :  { %v244_v20 = vpop.permute.xlu1 %243  ;;  %v231_v21 = vpop.permute.xlu0 %230 }
  0xd6   :  { %v248_v23 = vpop.permute.xlu1 %247  ;;  %v236_v24 = vpop.permute.xlu0 %235 }
  0xd7   :  { %v250_v25 = vsel %vm786_vm1, %v244_v20, %v248_v23  ;;  %v238_v26 = vsel %vm790_vm2, %v231_v21, %v236_v24 }
  0xd8   :  { %v251_v32 = vmul.f32 %v250_v25, %v238_v26 }
  0xdb   :  { %v262_v27 = vpop.permute.xlu1 %261  ;;  %v258_v28 = vpop.permute.xlu0 %257 }
  0xdc   :  { %v264_v30 = vsel %vm800_vm3, %v258_v28, %v262_v27 }
  0xdd   :  { %v265_v35 = vmul.f32 %v264_v30, %v251_v32 }
  0xe0   :  { %v272_v8 = vpop.permute.xlu1 %271  ;;  %v276_v36 = vpop.permute.xlu0 %275 }
  0xe1   :  { %v278_v37 = vsel %vm807_vm4, %v272_v8, %v276_v36 }
  0xe2   :  { %v279_v38 = vmul.f32 %v278_v37, %v265_v35 }
  0xe4   :  { %v284_v40 = vsel %vm283_vm10, %v279_v38, 0.0 }
  0xe5   :  { %v296_v41 = vmul.f32 %v295_v39, %v284_v40 }
  0xe7   :  { %v297_v42 = vpack.c.bf16 %v296_v41, %v296_v41 }
  0xe9   :  { %562 = vmatmul.mubr.bf16.vlgmr.msra.gmra.mxu0 %v297_v42 }
 0x1a9   :  { %v396_v3 = vpop.f32.mrf.mxu0 }
 0x1aa   :  { %v402_v45 = vmul.f32 %v396_v3, %v396_v3 }
 0x1ab   :  { %v563_v46 = vpop.f32.mrf.mxu0 }
 0x1ac   :  { %598 = vmatmul.mubr.f32.vlgmr.msra.gmra.mxu1 %v402_v45 }
 0x1ad   :  { %v399_v47 = vpop.f32.mrf.mxu0 }
 0x1af   :  { %v564_v48 = vpop.f32.mrf.mxu0 }
 0x26c   :  { %v485_v49 = vpop.f32.mrf.mxu1 }
 0x26d   :  { %v490_v50 = vand.u32 2147483647, %v485_v49  ;;  %v489_v56 = vmax.f32 %v485_v49, 0.0 }
 0x26e   :  { %v599_v51 = vpop.f32.mrf.mxu1 }
 0x26f   :  { %v491_v52 = vsub.f32 0.0, %v490_v50 }
 0x271   :  { %v492_v53 = vmul.f32 1.442695, %v491_v52 }
 0x273   :  { %634 = vpow2.f32 %v492_v53 }
 0x280   :  { %v635_v54 = vpop.eup %634 }
 0x281   :  { %v494_v55 = vadd.f32 1.0, %v635_v54 }
 0x283   :  { %636 = vlog2.f32 %v494_v55 }
 0x290   :  { %v637_v6 = vpop.eup %636 }
 0x291   :  { %v496_v57 = vmul.f32 0.6931472, %v637_v6 }
 0x293   :  { %v497_v58 = vadd.f32 %v496_v57, %v489_v56 }
 0x295   :  { %498 = vst [vmem:[%s837_s3] sm:$0xff] %v497_v58 }

</bundles_post_ra>
